<compile_context>
chip_gen: v5e
topology: v5e:2x2
jax: 0.10.0
libtpu: 0.0.40
codegen_flags: <defaults>
</compile_context>

<pallas_src>
import jax
import jax.numpy as jnp
from jax.experimental import pallas as pl
from jax.experimental.pallas import tpu as pltpu

_FEATURES = 4                      # input feature dim of fc1
_SAMPLES_PER_ROW = 32              # 32 samples * 4 features = 128 lanes
_LANES = _SAMPLES_PER_ROW * _FEATURES          # 128
_DEFAULT_TILE_ROWS = 8192          # rows of the [R, 128] view per grid step (4 MiB)


def _fused_mlp_kernel(x_ref, m_ref, o_ref):
    # x_ref: [T, 128] VMEM  (32 samples x 4 features interleaved per row)
    # m_ref: [128, 32] VMEM (resident fused-weight matrix, same block every step)
    # o_ref: [T, 32]  VMEM  (one result per sample, contiguous with [B, 1])
    o_ref[...] = jnp.dot(
        x_ref[...], m_ref[...], preferred_element_type=jnp.float32
    ).astype(o_ref.dtype)


def multilayer_forward(x, w1, w2, *, tile_rows=_DEFAULT_TILE_ROWS,
                       use_fast_path=True, fast_path_max_batch=4096):
    """x: [B, 4] f32, w1: [2, 4] f32, w2: [1, 2] f32 -> [B, 1] f32."""
    B, F = x.shape
    assert F == _FEATURES and w1.shape == (2, 4) and w2.shape == (1, 2)
    assert tile_rows % 8 == 0

    # Fuse the two bias-free, activation-free linear layers into one map.
    w_eff = (w2.astype(jnp.float32) @ w1.astype(jnp.float32)).reshape(F)   # [4]

    # Small-batch fast path: one fused XLA dot beats any kernel dispatch chain.
    if use_fast_path and B <= fast_path_max_batch:
        y = x.astype(jnp.float32) @ w_eff.reshape(F, 1)
        return y.astype(x.dtype)

    # Zero-copy lane-dense view of x: [B, 4] -> [R, 128].
    R = pl.cdiv(B, _SAMPLES_PER_ROW)
    x_flat = x.reshape(-1)
    if B % _SAMPLES_PER_ROW != 0:
        # Only the ragged tail is padded (zeros), on the flat view.
        x_flat = jnp.pad(x_flat, (0, R * _LANES - B * F))
    xr = x_flat.reshape(R, _LANES)

    # Expand the 4 fused weights into M[128, 32]: M[4j + f, j] = w_eff[f].
    m = jnp.kron(jnp.eye(_SAMPLES_PER_ROW, dtype=jnp.float32),
                 w_eff.reshape(F, 1))                                      # [128, 32]

    T = min(tile_rows, R)
    grid = (pl.cdiv(R, T),)

    out = pl.pallas_call(
        _fused_mlp_kernel,
        out_shape=jax.ShapeDtypeStruct((R, _SAMPLES_PER_ROW), jnp.float32),
        grid=grid,
        in_specs=[
            # x tile: contiguous rows of the flat view, fully lane-dense DMA.
            pl.BlockSpec((T, _LANES), lambda i: (i, 0)),
            # Fused-weight matrix: same block every step -> DMA'd once, resident.
            pl.BlockSpec((_LANES, _SAMPLES_PER_ROW), lambda i: (0, 0)),
        ],
        out_specs=pl.BlockSpec((T, _SAMPLES_PER_ROW), lambda i: (i, 0)),
        compiler_params=pltpu.CompilerParams(
            dimension_semantics=(pltpu.PARALLEL,)),
    )(xr, m)

    # [R, 32] is contiguous with [R*32]; slicing only happens for ragged B.
    y = out.reshape(-1)
    if R * _SAMPLES_PER_ROW != B:
        y = y[:B]
    return y.reshape(B, 1).astype(x.dtype)


def _reference(x, w1, w2):
    return (x @ w1.T) @ w2.T


if __name__ == "__main__":
    key = jax.random.PRNGKey(0)
    kx, k1, k2, kx2 = jax.random.split(key, 4)

    # Deterministic "parameters" of the right shapes (torch default init is
    # uniform; exact values don't matter).
    w1 = jax.random.uniform(k1, (2, 4), jnp.float32, -0.5, 0.5)
    w2 = jax.random.uniform(k2, (1, 2), jnp.float32, -0.7, 0.7)

    # 1) Small batch through the Pallas kernel (B=8 -> one [1,128] row, grid=(1,)).
    B = 8
    x = jax.random.normal(kx, (B, 4), jnp.float32)
    out = jax.block_until_ready(multilayer_forward(x, w1, w2, use_fast_path=False))
    ref = _reference(x, w1, w2)
    assert out.shape == (B, 1), out.shape
    assert jnp.allclose(out, ref, atol=1e-5, rtol=1e-5)

    # 2) Non-multiple-of-32 batch with a small tile -> multi-step pipelined grid.
    B2 = 1000
    x2 = jax.random.normal(kx2, (B2, 4), jnp.float32)
    out2 = jax.block_until_ready(
        multilayer_forward(x2, w1, w2, tile_rows=8, use_fast_path=False))
    ref2 = _reference(x2, w1, w2)
    assert out2.shape == (B2, 1), out2.shape
    assert jnp.allclose(out2, ref2, atol=1e-5, rtol=1e-5)

    # 3) Tile that does not divide the row count -> ragged last block (masked).
    out3 = jax.block_until_ready(
        multilayer_forward(x2, w1, w2, tile_rows=24, use_fast_path=False))
    assert jnp.allclose(out3, ref2, atol=1e-5, rtol=1e-5)

    # 4) Default small-batch fast path (pure XLA dot, no kernel dispatch).
    out4 = jax.block_until_ready(multilayer_forward(x2, w1, w2))
    assert jnp.allclose(out4, ref2, atol=1e-5, rtol=1e-5)

    print("KERNEL_OK")
</pallas_src>

<mosaic_0001>
module attributes {stable_mosaic.version = 11 : i64} {
  func.func @_fused_mlp_kernel(%arg0: i32, %arg1: memref<1x128xf32, #tpu.memory_space<vmem>>, %arg2: memref<128x32xf32, #tpu.memory_space<vmem>>, %arg3: memref<1x32xf32, #tpu.memory_space<vmem>>) attributes {dimension_semantics = [#tpu.dimension_semantics<parallel>], iteration_bounds = array<i64: 1>, scalar_prefetch = 0 : i64, scratch_operands = 0 : i64, tpu.core_type = #tpu.core_type<tc>, window_params = [{transform_indices = @transform_0, window_bounds = array<i64: 1, 128>}, {pipeline_mode = #tpu.pipeline_mode<synchronous>, transform_indices = @transform_1, window_bounds = array<i64: 128, 32>}, {transform_indices = @transform_2, window_bounds = array<i64: 1, 32>}]} {
    %c0 = arith.constant 0 : index
    %c0_0 = arith.constant 0 : index
    %0 = vector.load %arg1[%c0, %c0_0] : memref<1x128xf32, #tpu.memory_space<vmem>>, vector<1x128xf32>
    %c0_1 = arith.constant 0 : index
    %c0_2 = arith.constant 0 : index
    %1 = vector.load %arg2[%c0_1, %c0_2] : memref<128x32xf32, #tpu.memory_space<vmem>>, vector<128x32xf32>
    %cst = arith.constant dense<0.000000e+00> : vector<1x32xf32>
    %2 = tpu.matmul %0, %1, %cst {dimension_numbers = #tpu.dot_dimension_numbers<[1], [0], [0], [1], [0, 0, 1, 1], [], []>} : vector<1x128xf32>, vector<128x32xf32>, vector<1x32xf32> -> vector<1x32xf32>
    %c0_3 = arith.constant 0 : index
    %c0_4 = arith.constant 0 : index
    %3 = vector.load %arg3[%c0_3, %c0_4] : memref<1x32xf32, #tpu.memory_space<vmem>>, vector<1x32xf32>
    tpu.vector_store %arg3[%c0_3, %c0_4], %2 {strides = array<i32>} : memref<1x32xf32, #tpu.memory_space<vmem>>, vector<1x32xf32>,
    return
  }
  func.func @transform_0(%arg0: i32) -> (i32, i32) {
    %c0_i32 = arith.constant 0 : i32
    %c0_i32_0 = arith.constant 0 : i32
    return %arg0, %c0_i32 : i32, i32
  }
  func.func @transform_1(%arg0: i32) -> (i32, i32) {
    %c0_i32 = arith.constant 0 : i32
    %c0_i32_0 = arith.constant 0 : i32
    %c0_i32_1 = arith.constant 0 : i32
    return %c0_i32, %c0_i32_0 : i32, i32
  }
  func.func @transform_2(%arg0: i32) -> (i32, i32) {
    %c0_i32 = arith.constant 0 : i32
    %c0_i32_0 = arith.constant 0 : i32
    return %arg0, %c0_i32 : i32, i32
  }
}

</mosaic_0001>

<bundles_post_ra>
// kernel: tpu_custom_call.1
= control target key start
LH: loop header
LB: loop body
LE: loop exit
PB: predicated region body
PF: predicated region fallthrough
CT: control target
= control target key end

     0   :  { %s164_s0 = inlined_call_operand.vmem [shape: f32[1,128], index: 0, kind: input, shape index: {}]   ;;  %s165_s1 = inlined_call_operand.vmem [shape: f32[128,32], index: 1, kind: input, shape index: {}]   ;;  %s166_s2 = inlined_call_operand.hbm [shape: f32[1,32], index: 2, kind: output, shape index: {}]  }
   0x1   :  { %v28_v0 = vld [vmem:[%s165_s1 + $0x78] sm:$0xff]  ;;  %v27_v1 = vld [vmem:[%s165_s1 + $0x70] sm:$0xff]  ;;  %v26_v2 = vld [vmem:[%s165_s1 + $0x68] sm:$0xff] }
   0x2   :  { %29 = vmatpush.msra.mxu0 %v28_v0  ;;  %v25_v3 = vld [vmem:[%s165_s1 + $0x60] sm:$0xff] }
   0x4   :  { %30 = vmatpush.msra.mxu0 %v27_v1 }
   0x6   :  { %31 = vmatpush.msra.mxu0 %v26_v2 }
   0x7   :  { %7 = vsyncpa [#allocation3], 0  ;;  %v24_v4 = vld [vmem:[%s165_s1 + $0x58] sm:$0xff]  ;;  %v23_v5 = vld [vmem:[%s165_s1 + $0x50] sm:$0xff]  ;;  %s94_s15 = smov [#allocation2]   ;;  %s58_s19 = sshll.u32 %s166_s2, 4  ;;  %s59_s19 = int_to_ptr.hbm [resolvable:$true] %s58_s19 }
   0x8   :  { %32 = vmatpush.msra.mxu0 %v25_v3  ;;  %v22_v6 = vld [vmem:[%s165_s1 + $0x48] sm:$0xff]  ;;  %v21_v7 = vld [vmem:[%s165_s1 + $0x40] sm:$0xff]  ;;  %v20_v8 = vld [vmem:[%s165_s1 + $0x38] sm:$0xff]  ;;  %s56_s16 = sshll.u32 %s94_s15, 4  ;;  %vm49_vm0 = vcmask 253952   ;;  %s57_s16 = int_to_ptr.vmem [resolvable:$true] %s56_s16 }
   0x9   :  { %v19_v9 = vld [vmem:[%s165_s1 + $0x30] sm:$0xff]  ;;  %v18_v10 = vld [vmem:[%s165_s1 + $0x28] sm:$0xff]  ;;  %v17_v11 = vld [vmem:[%s165_s1 + $0x20] sm:$0xff] }
   0xa   :  { %33 = vmatpush.msra.mxu0 %v24_v4  ;;  %v16_v12 = vld [vmem:[%s165_s1 + $0x18] sm:$0xff]  ;;  %v15_v13 = vld [vmem:[%s165_s1 + $0x10] sm:$0xff]  ;;  %v14_v14 = vld [vmem:[%s165_s1 + $0x8] sm:$0xff] }
   0xb   :  { %v13_v15 = vld [vmem:[%s165_s1] sm:$0xff] }
   0xc   :  { %34 = vmatpush.msra.mxu0 %v23_v5  ;;  %v12_v16 = vld [vmem:[%s164_s0] sm:$0x1] }
   0xe   :  { %35 = vmatpush.msra.mxu0 %v22_v6 }
  0x10   :  { %36 = vmatpush.msra.mxu0 %v21_v7 }
  0x12   :  { %37 = vmatpush.msra.mxu0 %v20_v8 }
  0x14   :  { %38 = vmatpush.msra.mxu0 %v19_v9 }
  0x16   :  { %39 = vmatpush.msra.mxu0 %v18_v10 }
  0x18   :  { %40 = vmatpush.msra.mxu0 %v17_v11 }
  0x1a   :  { %41 = vmatpush.msra.mxu0 %v16_v12 }
  0x1c   :  { %42 = vmatpush.msra.mxu0 %v15_v13 }
  0x1e   :  { %43 = vmatpush.msra.mxu0 %v14_v14 }
  0x20   :  { %44 = vmatpush.msra.mxu0 %v13_v15 }
  0x21   :  { %45 = vmatmul.f32.vlgmr.msra.gmra.mxu0 %v12_v16 }
  0x9e   :  { %v46_v17 = vpop.f32.mrf.mxu0 }
  0x9f   :  { %50 = vst.msk [vmem:[#allocation2] sm:$0x1] %vm49_vm0, %v46_v17 }
  0xa0   :  { %61 = dma.vmem_to_hbm [thread:$0]  %s57_s16, 16, %s59_s19, [#allocation3]  }
  0xa1   :  { %92 = dma.done.wait [#allocation3], 16  }
  0xa2   :  { %93 = vsyncadd [#allocation3], 4294967280 }
  0xa3   :  { %66 = vsyncpa [#allocation3], 1 }

</bundles_post_ra>
